<compile_context>
chip_gen: v7x
topology: tpu7x:2x2x1
jax: 0.10.0
libtpu: 0.0.40
codegen_flags: <defaults>
</compile_context>

<pallas_src>
import jax
import jax.numpy as jnp
from jax.experimental import pallas as pl
from jax.experimental.pallas import tpu as pltpu

EPS = 1e-5          # nn.BatchNorm1d default
NEG_SLOPE = 0.01    # nn.LeakyReLU default
LANE = 128          # TPU lane width
N_LAYERS = 8        # 4 encoder + 4 decoder Linear layers


def _round_up(n, m):
    return ((n + m - 1) // m) * m


def _layer_dims(n_features, z_dim):
    """Raw and lane-padded (din, dout) for the 8 Linear layers.

    Intermediate widths are padded to multiples of 128 so every activation /
    matmul operand is lane-dense; the network's outer dims (first K, last N)
    stay at n_features so no host-side pad of x or slice of the output is
    needed.
    """
    raw = [(n_features, 200), (200, 100), (100, 50), (50, z_dim),     # encoder
           (z_dim, 50), (50, 100), (100, 200), (200, n_features)]     # decoder
    padded = []
    for li, (din, dout) in enumerate(raw):
        dp = din if li == 0 else _round_up(din, LANE)
        op = dout if li == N_LAYERS - 1 else _round_up(dout, LANE)
        padded.append((dp, op))
    return raw, padded


def make_sae_kernel(padded_dims, batch):
    """Build the fused encoder+decoder kernel for the given (static) dims."""
    inv_b = 1.0 / batch

    def kernel(x_ref, w_ref, vec_ref, out_ref):
        # x_ref:   (B, n_features)       f32
        # w_ref:   (8, K_max, N_max)     bf16 - per-layer (in, out) weights, zero-padded
        # vec_ref: (16, N_max)           f32  - rows 0..7 biases, 8..11 BN gamma,
        #                                        12..15 BN beta (encoder layers)
        h = x_ref[...]

        # ---- encoder: 4 x [Linear -> LeakyReLU -> BatchNorm1d (batch stats)] ----
        for li in range(4):
            din, dout = padded_dims[li]
            w = w_ref[li, :din, :dout]                       # lazy per-layer load (bf16)
            b = vec_ref[li:li + 1, :dout]                    # (1, dout) f32
            g = vec_ref[8 + li:9 + li, :dout]
            beta = vec_ref[12 + li:13 + li, :dout]

            h = jnp.dot(h.astype(jnp.bfloat16), w,
                        preferred_element_type=jnp.float32) + b
            h = jnp.where(h > 0, h, NEG_SLOPE * h)           # LeakyReLU

            # Single-pass batch stats: var = E[h^2] - mean^2 (biased, train mode),
            # folded BN: y = h * scale + shift.
            s1 = jnp.sum(h, axis=0, keepdims=True)           # XLU reductions
            s2 = jnp.sum(h * h, axis=0, keepdims=True)
            mean = s1 * inv_b
            var = jnp.maximum(s2 * inv_b - mean * mean, 0.0)
            scale = g * jax.lax.rsqrt(var + EPS)             # rsqrt -> EUP slot
            shift = beta - mean * scale
            h = h * scale + shift

        # ---- decoder: 3 x [Linear -> LeakyReLU], then Linear -> ReLU ----
        for li in range(4, 8):
            din, dout = padded_dims[li]
            w = w_ref[li, :din, :dout]
            b = vec_ref[li:li + 1, :dout]

            h = jnp.dot(h.astype(jnp.bfloat16), w,
                        preferred_element_type=jnp.float32) + b
            if li < 7:
                h = jnp.where(h > 0, h, NEG_SLOPE * h)       # LeakyReLU
            else:
                h = jnp.maximum(h, 0.0)                      # final ReLU

        out_ref[...] = h

    return kernel


def init_params(key, n_features, z_dim, w_dtype=jnp.bfloat16):
    """PyTorch-style init (U(-1/sqrt(fan_in), 1/sqrt(fan_in)); BN gamma=1, beta=0),
    packed into two buffers.

    Weights (pre-transposed to (in, out)) live in one (8, K_max, N_max) slab
    stored bf16-at-rest; biases / BN gamma / BN beta live in one (16, N_max)
    f32 slab.  All padded rows/cols — including padded gamma lanes — are
    exactly zero, so dead lanes carry exact zeros through the whole network.
    """
    raw, padded = _layer_dims(n_features, z_dim)
    k_max = max(d for d, _ in padded)
    n_max = max(o for _, o in padded)

    w_packed = jnp.zeros((N_LAYERS, k_max, n_max), jnp.float32)
    vec_packed = jnp.zeros((2 * N_LAYERS, n_max), jnp.float32)

    for li, (din, dout) in enumerate(raw):
        key, kw, kb = jax.random.split(key, 3)
        bound = 1.0 / (din ** 0.5)
        w = jax.random.uniform(kw, (din, dout), jnp.float32, -bound, bound)
        b = jax.random.uniform(kb, (dout,), jnp.float32, -bound, bound)
        w_packed = w_packed.at[li, :din, :dout].set(w)
        vec_packed = vec_packed.at[li, :dout].set(b)
        if li < 4:  # encoder layers carry BatchNorm params
            vec_packed = vec_packed.at[8 + li, :dout].set(1.0)  # gamma (padded lanes stay 0)
            # beta rows 12..15 stay zero

    return w_packed.astype(w_dtype), vec_packed


def george_sae_bn_forward(x, w_packed, vec_packed, n_features, z_dim):
    """x: (B, n_features) float32.  Returns (B, n_features) float32."""
    B, nf = x.shape
    assert nf == n_features
    _, padded = _layer_dims(n_features, z_dim)

    kernel = make_sae_kernel(padded, B)

    flops = 2 * B * sum(d * o for d, o in padded)
    transcendentals = sum(o for _, o in padded[:4])          # one rsqrt per BN feature
    bytes_accessed = (x.size * x.dtype.itemsize
                      + w_packed.size * w_packed.dtype.itemsize
                      + vec_packed.size * vec_packed.dtype.itemsize
                      + B * nf * 4)

    vmem = pl.BlockSpec(memory_space=pltpu.MemorySpace.VMEM)
    return pl.pallas_call(
        kernel,
        out_shape=jax.ShapeDtypeStruct((B, nf), jnp.float32),
        in_specs=[vmem, vmem, vmem],
        out_specs=vmem,
        cost_estimate=pl.CostEstimate(flops=flops,
                                      transcendentals=transcendentals,
                                      bytes_accessed=bytes_accessed),
    )(x, w_packed, vec_packed)


if __name__ == "__main__":
    n_features = 32
    z_dim = 8
    batch = 8  # BatchNorm needs batch > 1; multiple of 8 keeps sublanes dense

    key = jax.random.PRNGKey(0)
    key, kx = jax.random.split(key)
    x = jax.random.normal(kx, (batch, n_features), dtype=jnp.float32)

    w_packed, vec_packed = init_params(jax.random.PRNGKey(0), n_features, z_dim)

    out = george_sae_bn_forward(x, w_packed, vec_packed, n_features, z_dim)
    out = jax.block_until_ready(out)

    assert out.shape == (batch, n_features)
    assert bool(jnp.all(out >= 0.0))          # final ReLU
    assert bool(jnp.all(jnp.isfinite(out)))
    print("KERNEL_OK")
</pallas_src>

<mosaic_0001>
module attributes {stable_mosaic.version = 11 : i64} {
  func.func @kernel(%arg0: memref<8x32xf32, #tpu.memory_space<vmem>>, %arg1: memref<8x256x256xbf16, #tpu.memory_space<vmem>>, %arg2: memref<16x256xf32, #tpu.memory_space<vmem>>, %arg3: memref<8x32xf32, #tpu.memory_space<vmem>>) attributes {dimension_semantics = [], scalar_prefetch = 0 : i64, scratch_operands = 0 : i64, tpu.core_type = #tpu.core_type<tc>} {
    %c0 = arith.constant 0 : index
    %c0_0 = arith.constant 0 : index
    %0 = vector.load %arg0[%c0, %c0_0] : memref<8x32xf32, #tpu.memory_space<vmem>>, vector<8x32xf32>
    %c0_1 = arith.constant 0 : index
    %c0_2 = arith.constant 0 : index
    %c0_3 = arith.constant 0 : index
    %1 = vector.load %arg1[%c0_1, %c0_2, %c0_3] : memref<8x256x256xbf16, #tpu.memory_space<vmem>>, vector<1x32x256xbf16>
    %2 = vector.shape_cast %1 : vector<1x32x256xbf16> to vector<32x256xbf16>
    %c0_4 = arith.constant 0 : index
    %c0_5 = arith.constant 0 : index
    %3 = vector.load %arg2[%c0_4, %c0_5] : memref<16x256xf32, #tpu.memory_space<vmem>>, vector<1x256xf32>
    %c8 = arith.constant 8 : index
    %c0_6 = arith.constant 0 : index
    %4 = vector.load %arg2[%c8, %c0_6] : memref<16x256xf32, #tpu.memory_space<vmem>>, vector<1x256xf32>
    %c12 = arith.constant 12 : index
    %c0_7 = arith.constant 0 : index
    %5 = vector.load %arg2[%c12, %c0_7] : memref<16x256xf32, #tpu.memory_space<vmem>>, vector<1x256xf32>
    %6 = arith.truncf %0 : vector<8x32xf32> to vector<8x32xbf16>
    %cst = arith.constant dense<0.000000e+00> : vector<8x256xf32>
    %7 = tpu.matmul %6, %2, %cst {dimension_numbers = #tpu.dot_dimension_numbers<[1], [0], [0], [1], [0, 0, 1, 1], [], []>} : vector<8x32xbf16>, vector<32x256xbf16>, vector<8x256xf32> -> vector<8x256xf32>
    %8 = vector.broadcast %3 : vector<1x256xf32> to vector<8x256xf32>
    %9 = arith.addf %7, %8 : vector<8x256xf32>
    %cst_8 = arith.constant 0.000000e+00 : f32
    %10 = vector.broadcast %cst_8 : f32 to vector<8x256xf32>
    %11 = arith.cmpf ogt, %9, %10 : vector<8x256xf32>
    %cst_9 = arith.constant 0.00999999977 : f32
    %12 = vector.broadcast %cst_9 : f32 to vector<8x256xf32>
    %13 = arith.mulf %12, %9 : vector<8x256xf32>
    %14 = arith.select %11, %9, %13 : vector<8x256xi1>, vector<8x256xf32>
    %cst_10 = arith.constant dense<0.000000e+00> : vector<256xf32>
    %15 = vector.multi_reduction <add>, %14, %cst_10 [0] : vector<8x256xf32> to vector<256xf32>
    %16 = vector.shape_cast %15 : vector<256xf32> to vector<1x256xf32>
    %17 = arith.mulf %14, %14 : vector<8x256xf32>
    %cst_11 = arith.constant dense<0.000000e+00> : vector<256xf32>
    %18 = vector.multi_reduction <add>, %17, %cst_11 [0] : vector<8x256xf32> to vector<256xf32>
    %19 = vector.shape_cast %18 : vector<256xf32> to vector<1x256xf32>
    %cst_12 = arith.constant 1.250000e-01 : f32
    %20 = vector.broadcast %cst_12 : f32 to vector<1x256xf32>
    %21 = arith.mulf %16, %20 : vector<1x256xf32>
    %cst_13 = arith.constant 1.250000e-01 : f32
    %22 = vector.broadcast %cst_13 : f32 to vector<1x256xf32>
    %23 = arith.mulf %19, %22 : vector<1x256xf32>
    %24 = arith.mulf %21, %21 : vector<1x256xf32>
    %25 = arith.subf %23, %24 : vector<1x256xf32>
    %cst_14 = arith.constant 0.000000e+00 : f32
    %26 = vector.broadcast %cst_14 : f32 to vector<1x256xf32>
    %27 = arith.maximumf %25, %26 : vector<1x256xf32>
    %cst_15 = arith.constant 9.99999974E-6 : f32
    %28 = vector.broadcast %cst_15 : f32 to vector<1x256xf32>
    %29 = arith.addf %27, %28 : vector<1x256xf32>
    %30 = math.rsqrt %29 : vector<1x256xf32>
    %31 = arith.mulf %4, %30 : vector<1x256xf32>
    %32 = arith.mulf %21, %31 : vector<1x256xf32>
    %33 = arith.subf %5, %32 : vector<1x256xf32>
    %34 = vector.broadcast %31 : vector<1x256xf32> to vector<8x256xf32>
    %35 = arith.mulf %14, %34 : vector<8x256xf32>
    %36 = vector.broadcast %33 : vector<1x256xf32> to vector<8x256xf32>
    %37 = arith.addf %35, %36 : vector<8x256xf32>
    %c1 = arith.constant 1 : index
    %c0_16 = arith.constant 0 : index
    %c0_17 = arith.constant 0 : index
    %38 = vector.load %arg1[%c1, %c0_16, %c0_17] : memref<8x256x256xbf16, #tpu.memory_space<vmem>>, vector<1x256x128xbf16>
    %39 = vector.shape_cast %38 : vector<1x256x128xbf16> to vector<256x128xbf16>
    %c1_18 = arith.constant 1 : index
    %c0_19 = arith.constant 0 : index
    %40 = vector.load %arg2[%c1_18, %c0_19] : memref<16x256xf32, #tpu.memory_space<vmem>>, vector<1x128xf32>
    %c9 = arith.constant 9 : index
    %c0_20 = arith.constant 0 : index
    %41 = vector.load %arg2[%c9, %c0_20] : memref<16x256xf32, #tpu.memory_space<vmem>>, vector<1x128xf32>
    %c13 = arith.constant 13 : index
    %c0_21 = arith.constant 0 : index
    %42 = vector.load %arg2[%c13, %c0_21] : memref<16x256xf32, #tpu.memory_space<vmem>>, vector<1x128xf32>
    %43 = arith.truncf %37 : vector<8x256xf32> to vector<8x256xbf16>
    %cst_22 = arith.constant dense<0.000000e+00> : vector<8x128xf32>
    %44 = tpu.matmul %43, %39, %cst_22 {dimension_numbers = #tpu.dot_dimension_numbers<[1], [0], [0], [1], [0, 0, 1, 1], [], []>} : vector<8x256xbf16>, vector<256x128xbf16>, vector<8x128xf32> -> vector<8x128xf32>
    %45 = vector.broadcast %40 : vector<1x128xf32> to vector<8x128xf32>
    %46 = arith.addf %44, %45 : vector<8x128xf32>
    %cst_23 = arith.constant 0.000000e+00 : f32
    %47 = vector.broadcast %cst_23 : f32 to vector<8x128xf32>
    %48 = arith.cmpf ogt, %46, %47 : vector<8x128xf32>
    %cst_24 = arith.constant 0.00999999977 : f32
    %49 = vector.broadcast %cst_24 : f32 to vector<8x128xf32>
    %50 = arith.mulf %49, %46 : vector<8x128xf32>
    %51 = arith.select %48, %46, %50 : vector<8x128xi1>, vector<8x128xf32>
    %cst_25 = arith.constant dense<0.000000e+00> : vector<128xf32>
    %52 = vector.multi_reduction <add>, %51, %cst_25 [0] : vector<8x128xf32> to vector<128xf32>
    %53 = vector.shape_cast %52 : vector<128xf32> to vector<1x128xf32>
    %54 = arith.mulf %51, %51 : vector<8x128xf32>
    %cst_26 = arith.constant dense<0.000000e+00> : vector<128xf32>
    %55 = vector.multi_reduction <add>, %54, %cst_26 [0] : vector<8x128xf32> to vector<128xf32>
    %56 = vector.shape_cast %55 : vector<128xf32> to vector<1x128xf32>
    %cst_27 = arith.constant 1.250000e-01 : f32
    %57 = vector.broadcast %cst_27 : f32 to vector<1x128xf32>
    %58 = arith.mulf %53, %57 : vector<1x128xf32>
    %cst_28 = arith.constant 1.250000e-01 : f32
    %59 = vector.broadcast %cst_28 : f32 to vector<1x128xf32>
    %60 = arith.mulf %56, %59 : vector<1x128xf32>
    %61 = arith.mulf %58, %58 : vector<1x128xf32>
    %62 = arith.subf %60, %61 : vector<1x128xf32>
    %cst_29 = arith.constant 0.000000e+00 : f32
    %63 = vector.broadcast %cst_29 : f32 to vector<1x128xf32>
    %64 = arith.maximumf %62, %63 : vector<1x128xf32>
    %cst_30 = arith.constant 9.99999974E-6 : f32
    %65 = vector.broadcast %cst_30 : f32 to vector<1x128xf32>
    %66 = arith.addf %64, %65 : vector<1x128xf32>
    %67 = math.rsqrt %66 : vector<1x128xf32>
    %68 = arith.mulf %41, %67 : vector<1x128xf32>
    %69 = arith.mulf %58, %68 : vector<1x128xf32>
    %70 = arith.subf %42, %69 : vector<1x128xf32>
    %71 = vector.broadcast %68 : vector<1x128xf32> to vector<8x128xf32>
    %72 = arith.mulf %51, %71 : vector<8x128xf32>
    %73 = vector.broadcast %70 : vector<1x128xf32> to vector<8x128xf32>
    %74 = arith.addf %72, %73 : vector<8x128xf32>
    %c2 = arith.constant 2 : index
    %c0_31 = arith.constant 0 : index
    %c0_32 = arith.constant 0 : index
    %75 = vector.load %arg1[%c2, %c0_31, %c0_32] : memref<8x256x256xbf16, #tpu.memory_space<vmem>>, vector<1x128x128xbf16>
    %76 = vector.shape_cast %75 : vector<1x128x128xbf16> to vector<128x128xbf16>
    %c2_33 = arith.constant 2 : index
    %c0_34 = arith.constant 0 : index
    %77 = vector.load %arg2[%c2_33, %c0_34] : memref<16x256xf32, #tpu.memory_space<vmem>>, vector<1x128xf32>
    %c10 = arith.constant 10 : index
    %c0_35 = arith.constant 0 : index
    %78 = vector.load %arg2[%c10, %c0_35] : memref<16x256xf32, #tpu.memory_space<vmem>>, vector<1x128xf32>
    %c14 = arith.constant 14 : index
    %c0_36 = arith.constant 0 : index
    %79 = vector.load %arg2[%c14, %c0_36] : memref<16x256xf32, #tpu.memory_space<vmem>>, vector<1x128xf32>
    %80 = arith.truncf %74 : vector<8x128xf32> to vector<8x128xbf16>
    %cst_37 = arith.constant dense<0.000000e+00> : vector<8x128xf32>
    %81 = tpu.matmul %80, %76, %cst_37 {dimension_numbers = #tpu.dot_dimension_numbers<[1], [0], [0], [1], [0, 0, 1, 1], [], []>} : vector<8x128xbf16>, vector<128x128xbf16>, vector<8x128xf32> -> vector<8x128xf32>
    %82 = vector.broadcast %77 : vector<1x128xf32> to vector<8x128xf32>
    %83 = arith.addf %81, %82 : vector<8x128xf32>
    %cst_38 = arith.constant 0.000000e+00 : f32
    %84 = vector.broadcast %cst_38 : f32 to vector<8x128xf32>
    %85 = arith.cmpf ogt, %83, %84 : vector<8x128xf32>
    %cst_39 = arith.constant 0.00999999977 : f32
    %86 = vector.broadcast %cst_39 : f32 to vector<8x128xf32>
    %87 = arith.mulf %86, %83 : vector<8x128xf32>
    %88 = arith.select %85, %83, %87 : vector<8x128xi1>, vector<8x128xf32>
    %cst_40 = arith.constant dense<0.000000e+00> : vector<128xf32>
    %89 = vector.multi_reduction <add>, %88, %cst_40 [0] : vector<8x128xf32> to vector<128xf32>
    %90 = vector.shape_cast %89 : vector<128xf32> to vector<1x128xf32>
    %91 = arith.mulf %88, %88 : vector<8x128xf32>
    %cst_41 = arith.constant dense<0.000000e+00> : vector<128xf32>
    %92 = vector.multi_reduction <add>, %91, %cst_41 [0] : vector<8x128xf32> to vector<128xf32>
    %93 = vector.shape_cast %92 : vector<128xf32> to vector<1x128xf32>
    %cst_42 = arith.constant 1.250000e-01 : f32
    %94 = vector.broadcast %cst_42 : f32 to vector<1x128xf32>
    %95 = arith.mulf %90, %94 : vector<1x128xf32>
    %cst_43 = arith.constant 1.250000e-01 : f32
    %96 = vector.broadcast %cst_43 : f32 to vector<1x128xf32>
    %97 = arith.mulf %93, %96 : vector<1x128xf32>
    %98 = arith.mulf %95, %95 : vector<1x128xf32>
    %99 = arith.subf %97, %98 : vector<1x128xf32>
    %cst_44 = arith.constant 0.000000e+00 : f32
    %100 = vector.broadcast %cst_44 : f32 to vector<1x128xf32>
    %101 = arith.maximumf %99, %100 : vector<1x128xf32>
    %cst_45 = arith.constant 9.99999974E-6 : f32
    %102 = vector.broadcast %cst_45 : f32 to vector<1x128xf32>
    %103 = arith.addf %101, %102 : vector<1x128xf32>
    %104 = math.rsqrt %103 : vector<1x128xf32>
    %105 = arith.mulf %78, %104 : vector<1x128xf32>
    %106 = arith.mulf %95, %105 : vector<1x128xf32>
    %107 = arith.subf %79, %106 : vector<1x128xf32>
    %108 = vector.broadcast %105 : vector<1x128xf32> to vector<8x128xf32>
    %109 = arith.mulf %88, %108 : vector<8x128xf32>
    %110 = vector.broadcast %107 : vector<1x128xf32> to vector<8x128xf32>
    %111 = arith.addf %109, %110 : vector<8x128xf32>
    %c3 = arith.constant 3 : index
    %c0_46 = arith.constant 0 : index
    %c0_47 = arith.constant 0 : index
    %112 = vector.load %arg1[%c3, %c0_46, %c0_47] : memref<8x256x256xbf16, #tpu.memory_space<vmem>>, vector<1x128x128xbf16>
    %113 = vector.shape_cast %112 : vector<1x128x128xbf16> to vector<128x128xbf16>
    %c3_48 = arith.constant 3 : index
    %c0_49 = arith.constant 0 : index
    %114 = vector.load %arg2[%c3_48, %c0_49] : memref<16x256xf32, #tpu.memory_space<vmem>>, vector<1x128xf32>
    %c11 = arith.constant 11 : index
    %c0_50 = arith.constant 0 : index
    %115 = vector.load %arg2[%c11, %c0_50] : memref<16x256xf32, #tpu.memory_space<vmem>>, vector<1x128xf32>
    %c15 = arith.constant 15 : index
    %c0_51 = arith.constant 0 : index
    %116 = vector.load %arg2[%c15, %c0_51] : memref<16x256xf32, #tpu.memory_space<vmem>>, vector<1x128xf32>
    %117 = arith.truncf %111 : vector<8x128xf32> to vector<8x128xbf16>
    %cst_52 = arith.constant dense<0.000000e+00> : vector<8x128xf32>
    %118 = tpu.matmul %117, %113, %cst_52 {dimension_numbers = #tpu.dot_dimension_numbers<[1], [0], [0], [1], [0, 0, 1, 1], [], []>} : vector<8x128xbf16>, vector<128x128xbf16>, vector<8x128xf32> -> vector<8x128xf32>
    %119 = vector.broadcast %114 : vector<1x128xf32> to vector<8x128xf32>
    %120 = arith.addf %118, %119 : vector<8x128xf32>
    %cst_53 = arith.constant 0.000000e+00 : f32
    %121 = vector.broadcast %cst_53 : f32 to vector<8x128xf32>
    %122 = arith.cmpf ogt, %120, %121 : vector<8x128xf32>
    %cst_54 = arith.constant 0.00999999977 : f32
    %123 = vector.broadcast %cst_54 : f32 to vector<8x128xf32>
    %124 = arith.mulf %123, %120 : vector<8x128xf32>
    %125 = arith.select %122, %120, %124 : vector<8x128xi1>, vector<8x128xf32>
    %cst_55 = arith.constant dense<0.000000e+00> : vector<128xf32>
    %126 = vector.multi_reduction <add>, %125, %cst_55 [0] : vector<8x128xf32> to vector<128xf32>
    %127 = vector.shape_cast %126 : vector<128xf32> to vector<1x128xf32>
    %128 = arith.mulf %125, %125 : vector<8x128xf32>
    %cst_56 = arith.constant dense<0.000000e+00> : vector<128xf32>
    %129 = vector.multi_reduction <add>, %128, %cst_56 [0] : vector<8x128xf32> to vector<128xf32>
    %130 = vector.shape_cast %129 : vector<128xf32> to vector<1x128xf32>
    %cst_57 = arith.constant 1.250000e-01 : f32
    %131 = vector.broadcast %cst_57 : f32 to vector<1x128xf32>
    %132 = arith.mulf %127, %131 : vector<1x128xf32>
    %cst_58 = arith.constant 1.250000e-01 : f32
    %133 = vector.broadcast %cst_58 : f32 to vector<1x128xf32>
    %134 = arith.mulf %130, %133 : vector<1x128xf32>
    %135 = arith.mulf %132, %132 : vector<1x128xf32>
    %136 = arith.subf %134, %135 : vector<1x128xf32>
    %cst_59 = arith.constant 0.000000e+00 : f32
    %137 = vector.broadcast %cst_59 : f32 to vector<1x128xf32>
    %138 = arith.maximumf %136, %137 : vector<1x128xf32>
    %cst_60 = arith.constant 9.99999974E-6 : f32
    %139 = vector.broadcast %cst_60 : f32 to vector<1x128xf32>
    %140 = arith.addf %138, %139 : vector<1x128xf32>
    %141 = math.rsqrt %140 : vector<1x128xf32>
    %142 = arith.mulf %115, %141 : vector<1x128xf32>
    %143 = arith.mulf %132, %142 : vector<1x128xf32>
    %144 = arith.subf %116, %143 : vector<1x128xf32>
    %145 = vector.broadcast %142 : vector<1x128xf32> to vector<8x128xf32>
    %146 = arith.mulf %125, %145 : vector<8x128xf32>
    %147 = vector.broadcast %144 : vector<1x128xf32> to vector<8x128xf32>
    %148 = arith.addf %146, %147 : vector<8x128xf32>
    %c4 = arith.constant 4 : index
    %c0_61 = arith.constant 0 : index
    %c0_62 = arith.constant 0 : index
    %149 = vector.load %arg1[%c4, %c0_61, %c0_62] : memref<8x256x256xbf16, #tpu.memory_space<vmem>>, vector<1x128x128xbf16>
    %150 = vector.shape_cast %149 : vector<1x128x128xbf16> to vector<128x128xbf16>
    %c4_63 = arith.constant 4 : index
    %c0_64 = arith.constant 0 : index
    %151 = vector.load %arg2[%c4_63, %c0_64] : memref<16x256xf32, #tpu.memory_space<vmem>>, vector<1x128xf32>
    %152 = arith.truncf %148 : vector<8x128xf32> to vector<8x128xbf16>
    %cst_65 = arith.constant dense<0.000000e+00> : vector<8x128xf32>
    %153 = tpu.matmul %152, %150, %cst_65 {dimension_numbers = #tpu.dot_dimension_numbers<[1], [0], [0], [1], [0, 0, 1, 1], [], []>} : vector<8x128xbf16>, vector<128x128xbf16>, vector<8x128xf32> -> vector<8x128xf32>
    %154 = vector.broadcast %151 : vector<1x128xf32> to vector<8x128xf32>
    %155 = arith.addf %153, %154 : vector<8x128xf32>
    %cst_66 = arith.constant 0.000000e+00 : f32
    %156 = vector.broadcast %cst_66 : f32 to vector<8x128xf32>
    %157 = arith.cmpf ogt, %155, %156 : vector<8x128xf32>
    %cst_67 = arith.constant 0.00999999977 : f32
    %158 = vector.broadcast %cst_67 : f32 to vector<8x128xf32>
    %159 = arith.mulf %158, %155 : vector<8x128xf32>
    %160 = arith.select %157, %155, %159 : vector<8x128xi1>, vector<8x128xf32>
    %c5 = arith.constant 5 : index
    %c0_68 = arith.constant 0 : index
    %c0_69 = arith.constant 0 : index
    %161 = vector.load %arg1[%c5, %c0_68, %c0_69] : memref<8x256x256xbf16, #tpu.memory_space<vmem>>, vector<1x128x128xbf16>
    %162 = vector.shape_cast %161 : vector<1x128x128xbf16> to vector<128x128xbf16>
    %c5_70 = arith.constant 5 : index
    %c0_71 = arith.constant 0 : index
    %163 = vector.load %arg2[%c5_70, %c0_71] : memref<16x256xf32, #tpu.memory_space<vmem>>, vector<1x128xf32>
    %164 = arith.truncf %160 : vector<8x128xf32> to vector<8x128xbf16>
    %cst_72 = arith.constant dense<0.000000e+00> : vector<8x128xf32>
    %165 = tpu.matmul %164, %162, %cst_72 {dimension_numbers = #tpu.dot_dimension_numbers<[1], [0], [0], [1], [0, 0, 1, 1], [], []>} : vector<8x128xbf16>, vector<128x128xbf16>, vector<8x128xf32> -> vector<8x128xf32>
    %166 = vector.broadcast %163 : vector<1x128xf32> to vector<8x128xf32>
    %167 = arith.addf %165, %166 : vector<8x128xf32>
    %cst_73 = arith.constant 0.000000e+00 : f32
    %168 = vector.broadcast %cst_73 : f32 to vector<8x128xf32>
    %169 = arith.cmpf ogt, %167, %168 : vector<8x128xf32>
    %cst_74 = arith.constant 0.00999999977 : f32
    %170 = vector.broadcast %cst_74 : f32 to vector<8x128xf32>
    %171 = arith.mulf %170, %167 : vector<8x128xf32>
    %172 = arith.select %169, %167, %171 : vector<8x128xi1>, vector<8x128xf32>
    %c6 = arith.constant 6 : index
    %c0_75 = arith.constant 0 : index
    %c0_76 = arith.constant 0 : index
    %173 = vector.load %arg1[%c6, %c0_75, %c0_76] : memref<8x256x256xbf16, #tpu.memory_space<vmem>>, vector<1x128x256xbf16>
    %174 = vector.shape_cast %173 : vector<1x128x256xbf16> to vector<128x256xbf16>
    %c6_77 = arith.constant 6 : index
    %c0_78 = arith.constant 0 : index
    %175 = vector.load %arg2[%c6_77, %c0_78] : memref<16x256xf32, #tpu.memory_space<vmem>>, vector<1x256xf32>
    %176 = arith.truncf %172 : vector<8x128xf32> to vector<8x128xbf16>
    %cst_79 = arith.constant dense<0.000000e+00> : vector<8x256xf32>
    %177 = tpu.matmul %176, %174, %cst_79 {dimension_numbers = #tpu.dot_dimension_numbers<[1], [0], [0], [1], [0, 0, 1, 1], [], []>} : vector<8x128xbf16>, vector<128x256xbf16>, vector<8x256xf32> -> vector<8x256xf32>
    %178 = vector.broadcast %175 : vector<1x256xf32> to vector<8x256xf32>
    %179 = arith.addf %177, %178 : vector<8x256xf32>
    %cst_80 = arith.constant 0.000000e+00 : f32
    %180 = vector.broadcast %cst_80 : f32 to vector<8x256xf32>
    %181 = arith.cmpf ogt, %179, %180 : vector<8x256xf32>
    %cst_81 = arith.constant 0.00999999977 : f32
    %182 = vector.broadcast %cst_81 : f32 to vector<8x256xf32>
    %183 = arith.mulf %182, %179 : vector<8x256xf32>
    %184 = arith.select %181, %179, %183 : vector<8x256xi1>, vector<8x256xf32>
    %c7 = arith.constant 7 : index
    %c0_82 = arith.constant 0 : index
    %c0_83 = arith.constant 0 : index
    %185 = vector.load %arg1[%c7, %c0_82, %c0_83] : memref<8x256x256xbf16, #tpu.memory_space<vmem>>, vector<1x256x32xbf16>
    %186 = vector.shape_cast %185 : vector<1x256x32xbf16> to vector<256x32xbf16>
    %c7_84 = arith.constant 7 : index
    %c0_85 = arith.constant 0 : index
    %187 = vector.load %arg2[%c7_84, %c0_85] : memref<16x256xf32, #tpu.memory_space<vmem>>, vector<1x32xf32>
    %188 = arith.truncf %184 : vector<8x256xf32> to vector<8x256xbf16>
    %cst_86 = arith.constant dense<0.000000e+00> : vector<8x32xf32>
    %189 = tpu.matmul %188, %186, %cst_86 {dimension_numbers = #tpu.dot_dimension_numbers<[1], [0], [0], [1], [0, 0, 1, 1], [], []>} : vector<8x256xbf16>, vector<256x32xbf16>, vector<8x32xf32> -> vector<8x32xf32>
    %190 = vector.broadcast %187 : vector<1x32xf32> to vector<8x32xf32>
    %191 = arith.addf %189, %190 : vector<8x32xf32>
    %cst_87 = arith.constant 0.000000e+00 : f32
    %192 = vector.broadcast %cst_87 : f32 to vector<8x32xf32>
    %193 = arith.maximumf %191, %192 : vector<8x32xf32>
    %c0_88 = arith.constant 0 : index
    %c0_89 = arith.constant 0 : index
    %194 = vector.load %arg3[%c0_88, %c0_89] : memref<8x32xf32, #tpu.memory_space<vmem>>, vector<8x32xf32>
    tpu.vector_store %arg3[%c0_88, %c0_89], %193 {strides = array<i32>} : memref<8x32xf32, #tpu.memory_space<vmem>>, vector<8x32xf32>,
    return
  }
}

</mosaic_0001>

<bundles_post_ra>
// kernel: tpu_custom_call.1
= control target key start
LH: loop header
LB: loop body
LE: loop exit
PB: predicated region body
PF: predicated region fallthrough
CT: control target
= control target key end

     0   :  { %8 = vsyncpa [#allocation3], 0  ;;  %s1889_s0 = inlined_call_operand.hbm [shape: f32[8,32], index: 0, kind: input, shape index: {}]   ;;  %s1890_s1 = inlined_call_operand.hbm [shape: bf16[8,256,256], index: 1, kind: input, shape index: {}]   ;;  %s1891_s2 = inlined_call_operand.hbm [shape: f32[16,256], index: 2, kind: input, shape index: {}]   ;;  %s1892_s3 = inlined_call_operand.hbm [shape: f32[8,32], index: 3, kind: output, shape index: {}]  }
   0x1   :  { %9 = vsyncpa [#allocation6], 0 }
   0x2   :  { %10 = vsyncpa [#allocation4], 0  ;;  %s1753_s12 = smov [#allocation5]   ;;  %s1659_s16 = scalar_lea.hbm %s1890_s1, 32768 }
   0x3   :  { %s26_s13 = sshll.u32 %s1753_s12, 4  ;;  %p1660_p0 = scmp.ne.s32.totalorder %s1890_s1, %s1659_s16  ;;  %s27_s13 = int_to_ptr.vmem [resolvable:$true] %s26_s13 }
   0x4   :  { %p1663_p1 = scmp.lt.u32.totalorder %s1659_s16, %s1890_s1 }
   0x6   :  { %p1665_p2 = pnand %p1663_p1, %p1660_p0 }
   0x8   :  { %1668 = shalt.err (!%p1665_p2)
}
   0x9   :  { %s1669_s21 = scalar_lea.vmem %s27_s13, 32768  ;;  %p1674_p4 = scmp.lt.s32.totalorder %s27_s13, %s27_s13 }
   0xa   :  { %p1670_p3 = scmp.ne.s32.totalorder %s27_s13, %s1669_s21  ;;  %p1675_p5 = scmp.lt.s32.totalorder %s1669_s21, %s1669_s21 }
   0xc   :  { %p1676_p6 = por %p1675_p5, %p1674_p4 }
   0xe   :  { %p1677_p7 = pnand %p1676_p6, %p1670_p3 }
  0x10   :  { %1680 = shalt.err (!%p1677_p7)
}
  0x11   :  { %s1754_s22 = smov 128   ;;  %s1755_s23 = smov 8  }
  0x12   :  { %32 = dma.hbm_to_vmem [thread:$0]  %s1890_s1, 32768, %s27_s13, [#allocation6], %s1754_s22, %s1754_s22, %s1755_s23  }
  0x13   :  { %s1756_s26 = smov [#allocation2]   ;;  %s1757_s28 = smov [#allocation7]  }
  0x14   :  { %s17_s27 = sshll.u32 %s1756_s26, 4  ;;  %s38_s29 = sshll.u32 %s1757_s28, 4  ;;  %s18_s27 = int_to_ptr.vmem [resolvable:$true] %s17_s27  ;;  %s39_s29 = int_to_ptr.vmem [resolvable:$true] %s38_s29 }
  0x15   :  { %s1681_s5 = scalar_lea.hbm %s1889_s0, 128 }
  0x16   :  { %p1682_p8 = scmp.ne.s32.totalorder %s1889_s0, %s1681_s5  ;;  %p1685_p9 = scmp.lt.u32.totalorder %s1681_s5, %s1889_s0 }
  0x18   :  { %p1687_p10 = pnand %p1685_p9, %p1682_p8 }
  0x1a   :  { %1690 = shalt.err (!%p1687_p10)
}
  0x1b   :  { %s1691_s1 = scalar_lea.vmem %s18_s27, 128  ;;  %p1696_p12 = scmp.lt.s32.totalorder %s18_s27, %s18_s27 }
  0x1c   :  { %p1692_p11 = scmp.ne.s32.totalorder %s18_s27, %s1691_s1  ;;  %p1697_p13 = scmp.lt.s32.totalorder %s1691_s1, %s1691_s1 }
  0x1e   :  { %p1698_p0 = por %p1697_p13, %p1696_p12 }
  0x20   :  { %p1699_p1 = pnand %p1698_p0, %p1692_p11 }
  0x22   :  { %1702 = shalt.err (!%p1699_p1)
}
  0x23   :  { %20 = dma.hbm_to_vmem [thread:$0]  %s1889_s0, 128, %s18_s27, [#allocation3]  }
  0x24   :  { %s1703_s14 = scalar_lea.hbm %s1891_s2, 512 }
  0x25   :  { %p1704_p2 = scmp.ne.s32.totalorder %s1891_s2, %s1703_s14  ;;  %p1707_p3 = scmp.lt.u32.totalorder %s1703_s14, %s1891_s2 }
  0x27   :  { %p1709_p4 = pnand %p1707_p3, %p1704_p2 }
  0x29   :  { %1712 = shalt.err (!%p1709_p4)
}
  0x2a   :  { %s1713_s19 = scalar_lea.vmem %s39_s29, 512  ;;  %p1718_p6 = scmp.lt.s32.totalorder %s39_s29, %s39_s29 }
  0x2b   :  { %p1714_p5 = scmp.ne.s32.totalorder %s39_s29, %s1713_s19  ;;  %p1719_p7 = scmp.lt.s32.totalorder %s1713_s19, %s1713_s19 }
  0x2d   :  { %p1720_p8 = por %p1719_p7, %p1718_p6 }
  0x2f   :  { %p1721_p9 = pnand %p1720_p8, %p1714_p5 }
  0x31   :  { %1724 = shalt.err (!%p1721_p9)
}
  0x32   :  { %s1758_s0 = smov 256   ;;  %s1759_s20 = smov 16  }
  0x33   :  { %44 = dma.hbm_to_vmem [thread:$0]  %s1891_s2, 512, %s39_s29, [#allocation6], %s1758_s0, %s1758_s0, %s1759_s20  }
  0x34   :  { %1747 = dma.done.wait [#allocation3], 128  }
  0x35   :  { %1748 = vsyncadd [#allocation3], 4294967168 }
  0x36   :  { %1749 = dma.done.wait [#allocation6], 33280  }
  0x37   :  { %1750 = vsyncadd [#allocation6], 4294934016  ;;  %v1760_v0 = vmov 0   ;;  %v1555_v1 = vld [vmem:[#allocation5 + $0x4] ss:$8 sps:$4 sm:$0xff]   ;;  %v55_v5 = vld [vmem:[#allocation2] sm:$0xff]  ;;  %v67_v23 = vlaneseq }
  0x38   :  { %133 = vmatprep.mubr.bf16.mxu0 %v1760_v0  ;;  %v1557_v2 = vld [vmem:[#allocation5] ss:$8 sps:$4 sm:$0xff]   ;;  %101 = vmatprep.subr.bf16.mxu0 %v1555_v1  ;;  %v1558_v3 = vld [vmem:[#allocation5 + $0x14] ss:$8 sps:$4 sm:$0xff]   ;;  %v1560_v4 = vld [vmem:[#allocation5 + $0x10] ss:$8 sps:$4 sm:$0xff]   ;;  %v65_v6 = vpack.c.bf16 %v55_v5, %v55_v5 }
  0x39   :  { %102 = vmatpush1.bf16.msra.mxu0 %v1557_v2  ;;  %vm97_vm0 = vcmask 261120   ;;  %v1561_v7 = vld [vmem:[#allocation5 + $0x180] ss:$8 sps:$4 sm:$0xff]   ;;  %v1563_v9 = vld [vmem:[#allocation5 + $0x190] ss:$8 sps:$4 sm:$0xff]   ;;  %v68_v24 = vshrl.u32 %v67_v23, 7 }
  0x3a   :  { %103 = vmatprep.subr.bf16.mxu0 %v1558_v3  ;;  %v1562_v8 = vld [vmem:[#allocation5 + $0x100] ss:$8 sps:$4 sm:$0xff]   ;;  %1383 = vmatprep.subr.bf16.mxu1 %v1561_v7  ;;  %v1564_v10 = vld [vmem:[#allocation5 + $0x110] ss:$8 sps:$4 sm:$0xff]   ;;  %vm1763_vm3 = vmmov 0   ;;  %s1764_s2 = smov [#allocation8]  }
  0x3b   :  { %1384 = vmatpush3.bf16.msra.mxu1 %v1562_v8  ;;  %v1565_v11 = vld [vmem:[#allocation5 + $0x1a0] ss:$8 sps:$4 sm:$0xff]   ;;  %v1567_v13 = vld [vmem:[#allocation5 + $0x1b0] ss:$8 sps:$4 sm:$0xff]   ;;  %v1823_v25 = vsub.s32 0, %v68_v24  ;;  %v1825_v27 = vsub.s32 1, %v68_v24 }
  0x3c   :  { %1385 = vmatprep.subr.bf16.mxu1 %v1563_v9  ;;  %v1566_v12 = vld [vmem:[#allocation5 + $0x120] ss:$8 sps:$4 sm:$0xff]   ;;  %v1568_v14 = vld [vmem:[#allocation5 + $0x130] ss:$8 sps:$4 sm:$0xff]   ;;  %s1288_s23 = sshll.u32 %s1764_s2, 4  ;;  %s1289_s23 = int_to_ptr.vmem [resolvable:$true] %s1288_s23 }
  0x3d   :  { %104 = vmatpush1.bf16.msra.mxu0 %v1560_v4  ;;  %v1569_v15 = vld [vmem:[#allocation5 + $0x1c0] ss:$8 sps:$4 sm:$0xff]   ;;  %v1571_v17 = vld [vmem:[#allocation5 + $0x1d0] ss:$8 sps:$4 sm:$0xff]   ;;  %s1725_s24 = scalar_lea.vmem %s1289_s23, 128  ;;  %p1730_p11 = scmp.lt.s32.totalorder %s1289_s23, %s1289_s23 }
  0x3e   :  { %v1570_v16 = vld [vmem:[#allocation5 + $0x140] ss:$8 sps:$4 sm:$0xff]   ;;  %v1572_v18 = vld [vmem:[#allocation5 + $0x150] ss:$8 sps:$4 sm:$0xff]   ;;  %p1726_p10 = scmp.ne.s32.totalorder %s1289_s23, %s1725_s24  ;;  %p1731_p12 = scmp.lt.s32.totalorder %s1725_s24, %s1725_s24 }
  0x3f   :  { %1386 = vmatpush3.bf16.msra.mxu1 %v1564_v10  ;;  %v1573_v19 = vld [vmem:[#allocation5 + $0x1e0] ss:$8 sps:$4 sm:$0xff]   ;;  %v1575_v21 = vld [vmem:[#allocation5 + $0x1f0] ss:$8 sps:$4 sm:$0xff]  }
  0x40   :  { %1302 = vmatmul.mubr.msk.bf16.vlgmr.msra.gmra.mrb[0].mxu0 %vm97_vm0, %v65_v6  ;;  %1387 = vmatprep.subr.bf16.mxu1 %v1565_v11  ;;  %v1574_v20 = vld [vmem:[#allocation5 + $0x160] ss:$8 sps:$4 sm:$0xff]   ;;  %v1576_v22 = vld [vmem:[#allocation5 + $0x170] ss:$8 sps:$4 sm:$0xff]   ;;  %p1732_p13 = por %p1731_p12, %p1730_p11 }
  0x41   :  { %v60_v26 = vld [vmem:[#allocation7] ss:$8 sm:$0x3]  ;;  %v62_v23 = vld [vmem:[#allocation7 + $0x10] ss:$8 sm:$0x3] }
  0x42   :  { %v70_v28 = vrot.slane %v60_v26, %v1823_v25  ;;  %v74_v29 = vrot.slane %v60_v26, %v1825_v27  ;;  %p1733_p0 = pnand %p1732_p13, %p1726_p10 }
  0x43   :  { %1388 = vmatpush3.bf16.msra.mxu1 %v1566_v12 }
  0x44   :  { %1389 = vmatprep.subr.bf16.mxu1 %v1567_v13 }
  0x47   :  { %1390 = vmatpush3.bf16.msra.mxu1 %v1568_v14 }
  0x48   :  { %1391 = vmatprep.subr.bf16.mxu1 %v1569_v15  ;;  %v1761_v15 = vmov 1966171168  }
  0x4b   :  { %1392 = vmatpush3.bf16.msra.mxu1 %v1570_v16  ;;  %v192_v16 = vunpack.c.l.s4 %v1761_v15 }
  0x4c   :  { %1393 = vmatprep.subr.bf16.mxu1 %v1571_v17 }
  0x4d   :  { %v193_v17 = vunpack.c.0.s8 %v192_v16 }
  0x4f   :  { %1394 = vmatpush3.bf16.msra.mxu1 %v1572_v18 }
  0x50   :  { %1395 = vmatprep.subr.bf16.mxu1 %v1573_v19  ;;  %v196_v19 = vsub.s32 %v193_v17, %v68_v24 }
  0x53   :  { %1396 = vmatpush3.bf16.msra.mxu1 %v1574_v20 }
  0x54   :  { %1397 = vmatprep.subr.bf16.mxu1 %v1575_v21 }
  0x57   :  { %1398 = vmatpush3.bf16.msra.mxu1 %v1576_v22 }
 0x113   :  { %v135_v30 = vpop.f32.mrb[0].mxu0 }
 0x114   :  { %v136_v31 = vadd.f32 %v135_v30, %v70_v28  ;;  %v137_v32 = vpop.f32.mrb[1].mxu0 }
 0x115   :  { %v138_v33 = vadd.f32 %v137_v32, %v74_v29  ;;  %v139_v34 = vpop.f32.mrb[2].mxu0 }
 0x116   :  { %vm142_vm1 = vcmp.gt.f32.partialorder %v136_v31, 0.0  ;;  %v144_v35 = vmul.f32 0.01, %v136_v31  ;;  %v140_v36 = vpop.f32.mrb[3].mxu0 }
 0x117   :  { %vm143_vm2 = vcmp.gt.f32.partialorder %v138_v33, 0.0  ;;  %v145_v37 = vmul.f32 0.01, %v138_v33 }
 0x118   :  { %v146_v38 = vsel %vm142_vm1, %v136_v31, %v144_v35 }
 0x119   :  { %v148_v39 = vrot.slane %v146_v38, 4  ;;  %v160_v40 = vmul.f32 %v146_v38, %v146_v38  ;;  %v147_v41 = vsel %vm143_vm2, %v138_v33, %v145_v37  ;;  %v64_v37 = vld [vmem:[#allocation7 + $0x14] ss:$8 sm:$0x3] }
 0x11a   :  { %v154_v42 = vrot.slane %v147_v41, 4  ;;  %v161_v43 = vmul.f32 %v147_v41, %v147_v41 }
 0x11b   :  { %v149_v44 = vadd.f32 %v148_v39, %v146_v38  ;;  %v162_v45 = vrot.slane %v160_v40, 4 }
 0x11c   :  { %v155_v46 = vadd.f32 %v154_v42, %v147_v41  ;;  %v168_v47 = vrot.slane %v161_v43, 4 }
 0x11d   :  { %v150_v48 = vrot.slane %v149_v44, 2  ;;  %v163_v49 = vadd.f32 %v162_v45, %v160_v40 }
 0x11e   :  { %v156_v50 = vrot.slane %v155_v46, 2  ;;  %v169_v51 = vadd.f32 %v168_v47, %v161_v43  ;;  %v1577_v47 = vld [vmem:[#allocation5 + $0x200] ss:$8 sps:$4 sm:$0xff]  }
 0x11f   :  { %v151_v52 = vadd.f32 %v150_v48, %v149_v44  ;;  %v164_v53 = vrot.slane %v163_v49, 2  ;;  %v1762_v48 = vmov 0.0  }
 0x120   :  { %v170_v54 = vrot.slane %v169_v51, 2  ;;  %v157_v55 = vadd.f32 %v156_v50, %v155_v46  ;;  %1463 = vmatprep.subr.bf16.mxu0 %v1762_v48  ;;  %1483 = vmatprep.subr.bf16.mxu1 %v1762_v48  ;;  %v1581_v50 = vld [vmem:[#allocation5 + $0x240] ss:$8 sps:$4 sm:$0xff]  }
 0x121   :  { %v152_v56 = vrot.slane %v151_v52, 1  ;;  %v165_v57 = vadd.f32 %v164_v53, %v163_v49  ;;  %1464 = vmatpush3.bf16.msra.mxu0 %v1577_v47  ;;  %1479 = vmatprep.mubr.msk.bf16.mxu0 %vm1763_vm3, %v1762_v48  ;;  %v1580_v49 = vld [vmem:[#allocation5 + $0x230] ss:$8 sps:$4 sm:$0xff]  }
 0x122   :  { %v171_v58 = vadd.f32 %v170_v54, %v169_v51  ;;  %v158_v59 = vrot.slane %v157_v55, 1  ;;  %1465 = vmatprep.subr.bf16.mxu0 %v1762_v48  ;;  %v1582_v51 = vld [vmem:[#allocation5 + $0x250] ss:$8 sps:$4 sm:$0xff]  }
 0x123   :  { %v166_v60 = vrot.slane %v165_v57, 1  ;;  %v153_v61 = vadd.f32 %v152_v56, %v151_v52  ;;  %v1583_v52 = vld [vmem:[#allocation5 + $0x260] ss:$8 sps:$4 sm:$0xff]   ;;  %v1584_v53 = vld [vmem:[#allocation5 + $0x270] ss:$8 sps:$4 sm:$0xff]  }
 0x124   :  { %v172_v62 = vrot.slane %v171_v58, 1  ;;  %v159_v63 = vadd.f32 %v158_v59, %v157_v55  ;;  %v287_v55 = vld [vmem:[#allocation7 + $0x1] ss:$0 sm:$0xff] }
 0x125   :  { %v167_v1 = vadd.f32 %v166_v60, %v165_v57  ;;  %v174_v2 = vmul.f32 0.125, %v153_v61 }
 0x126   :  { %v173_v3 = vadd.f32 %v172_v62, %v171_v58  ;;  %v175_v4 = vmul.f32 0.125, %v159_v63 }
 0x127   :  { %v176_v5 = vmul.f32 0.125, %v167_v1  ;;  %v178_v6 = vmul.f32 %v174_v2, %v174_v2 }
 0x128   :  { %v177_v7 = vmul.f32 0.125, %v173_v3  ;;  %v179_v8 = vmul.f32 %v175_v4, %v175_v4 }
 0x129   :  { %v180_v9 = vsub.f32 %v176_v5, %v178_v6 }
 0x12a   :  { %v181_v10 = vsub.f32 %v177_v7, %v179_v8 }
 0x12b   :  { %v182_v11 = vmax.f32 %v180_v9, 0.0 }
 0x12c   :  { %v183_v12 = vmax.f32 %v181_v10, 0.0 }
 0x12d   :  { %v184_v13 = vadd.f32 1e-05, %v182_v11 }
 0x12e   :  { %v185_v14 = vadd.f32 1e-05, %v183_v12 }
 0x12f   :  { %1649 = vrsqrt.f32 %v184_v13 }
 0x130   :  { %1651 = vrsqrt.f32 %v185_v14 }
 0x139   :  { %v1650_v18 = vpop.eup %1649 }
 0x13a   :  { %v1652_v20 = vpop.eup %1651 }
 0x13b   :  { %v190_v21 = vcombine.low %v1650_v18, %v1652_v20 }
 0x13d   :  { %v197_v22 = vrot.slane %v190_v21, %v196_v19 }
 0x13f   :  { %v204_v26 = vrot.slane %v197_v22, %v196_v19  ;;  %v289_v22 = vld [vmem:[#allocation7 + $0x15] ss:$0 sm:$0xff] }
 0x141   :  { %v206_v28 = vmul.f32 %v204_v26, %v62_v23 }
 0x143   :  { %v211_v29 = vrot.slane %v206_v28, %v1823_v25  ;;  %v215_v30 = vrot.slane %v206_v28, %v1825_v27 }
 0x145   :  { %v218_v31 = vmul.f32 %v211_v29, %v174_v2  ;;  %v219_v32 = vmul.f32 %v215_v30, %v175_v4  ;;  %v240_v33 = vmul.f32 %v215_v30, %v147_v41  ;;  %v239_v34 = vmul.f32 %v211_v29, %v146_v38  ;;  %v1578_v38 = vld [vmem:[#allocation5 + $0x210] ss:$8 sps:$4 sm:$0xff]   ;;  %v1579_v41 = vld [vmem:[#allocation5 + $0x220] ss:$8 sps:$4 sm:$0xff]  }
 0x146   :  { %1466 = vmatpush3.bf16.msra.mxu0 %v1578_v38 }
 0x147   :  { %v222_v35 = vcombine.low %v218_v31, %v219_v32  ;;  %1467 = vmatprep.subr.bf16.mxu0 %v1762_v48  ;;  %v1585_v31 = vld [vmem:[#allocation5 + $0x300] ss:$8 sps:$4 sm:$0xff]   ;;  %v1586_v32 = vld [vmem:[#allocation5 + $0x310] ss:$8 sps:$4 sm:$0xff]  }
 0x149   :  { %v229_v36 = vrot.slane %v222_v35, %v196_v19  ;;  %v1589_v35 = vld [vmem:[#allocation5 + $0x340] ss:$8 sps:$4 sm:$0xff]  }
 0x14a   :  { %1468 = vmatpush3.bf16.msra.mxu0 %v1579_v41 }
 0x14b   :  { %v236_v39 = vrot.slane %v229_v36, %v196_v19  ;;  %1469 = vmatprep.subr.bf16.mxu0 %v1762_v48  ;;  %v288_v19 = vld [vmem:[#allocation7 + $0x11] ss:$0 sm:$0xff] }
 0x14c   :  { %v1590_v36 = vld [vmem:[#allocation5 + $0x350] ss:$8 sps:$4 sm:$0xff]  }
 0x14d   :  { %v238_v40 = vsub.f32 %v64_v37, %v236_v39  ;;  %v1591_v37 = vld [vmem:[#allocation5 + $0x360] ss:$8 sps:$4 sm:$0xff]   ;;  %v1592_v39 = vld [vmem:[#allocation5 + $0x370] ss:$8 sps:$4 sm:$0xff]  }
 0x14e   :  { %1470 = vmatpush3.bf16.msra.mxu0 %v1580_v49 }
 0x14f   :  { %v249_v24 = vrot.slane %v238_v40, %v1825_v27  ;;  %v245_v42 = vrot.slane %v238_v40, %v1823_v25  ;;  %1471 = vmatprep.subr.bf16.mxu0 %v1762_v48  ;;  %v473_v40 = vld [vmem:[#allocation7 + $0x2] ss:$0 sm:$0xff] }
 0x151   :  { %v253_v43 = vadd.f32 %v249_v24, %v240_v33  ;;  %v252_v44 = vadd.f32 %v245_v42, %v239_v34  ;;  %v1587_v33 = vld [vmem:[#allocation5 + $0x320] ss:$8 sps:$4 sm:$0xff]   ;;  %v1588_v34 = vld [vmem:[#allocation5 + $0x330] ss:$8 sps:$4 sm:$0xff]  }
 0x152   :  { %1472 = vmatpush3.bf16.msra.mxu0 %v1581_v50 }
 0x153   :  { %v291_v45 = vpack.c.bf16 %v253_v43, %v253_v43  ;;  %v290_v46 = vpack.c.bf16 %v252_v44, %v252_v44  ;;  %1473 = vmatprep.subr.bf16.mxu0 %v1762_v48 }
 0x155   :  { %420 = vmatprep.mubr.bf16.mxu1 %v291_v45 }
 0x156   :  { %421 = vmatmul.mubr.bf16.vlgmr.msra.gmra.mrb[0].mxu1 %v290_v46  ;;  %1474 = vmatpush3.bf16.msra.mxu0 %v1582_v51 }
 0x157   :  { %1499 = vmatprep.mubr.msk.bf16.mxu1 %vm1763_vm3, %v1762_v48  ;;  %1475 = vmatprep.subr.bf16.mxu0 %v1762_v48 }
 0x158   :  { %1484 = vmatpush3.bf16.msra.mxu1 %v1585_v31 }
 0x159   :  { %1485 = vmatprep.subr.bf16.mxu1 %v1762_v48 }
 0x15a   :  { %1476 = vmatpush3.bf16.msra.mxu0 %v1583_v52 }
 0x15b   :  { %1477 = vmatprep.subr.bf16.mxu0 %v1762_v48 }
 0x15c   :  { %1486 = vmatpush3.bf16.msra.mxu1 %v1586_v32 }
 0x15d   :  { %1487 = vmatprep.subr.bf16.mxu1 %v1762_v48 }
 0x15e   :  { %1478 = vmatpush3.bf16.msra.mxu0 %v1584_v53 }
 0x15f   :  { %1503 = vmatprep.subr.bf16.mxu0 %v1762_v48 }
 0x160   :  { %1488 = vmatpush3.bf16.msra.mxu1 %v1587_v33 }
 0x161   :  { %1489 = vmatprep.subr.bf16.mxu1 %v1762_v48 }
 0x164   :  { %1490 = vmatpush3.bf16.msra.mxu1 %v1588_v34 }
 0x165   :  { %1491 = vmatprep.subr.bf16.mxu1 %v1762_v48 }
 0x168   :  { %1492 = vmatpush3.bf16.msra.mxu1 %v1589_v35 }
 0x169   :  { %1493 = vmatprep.subr.bf16.mxu1 %v1762_v48 }
 0x16c   :  { %1494 = vmatpush3.bf16.msra.mxu1 %v1590_v36 }
 0x16d   :  { %1495 = vmatprep.subr.bf16.mxu1 %v1762_v48 }
 0x170   :  { %1496 = vmatpush3.bf16.msra.mxu1 %v1591_v37 }
 0x171   :  { %1497 = vmatprep.subr.bf16.mxu1 %v1762_v48 }
 0x174   :  { %1498 = vmatpush3.bf16.msra.mxu1 %v1592_v39 }
 0x175   :  { %1523 = vmatprep.subr.bf16.mxu1 %v1762_v48 }
 0x229   :  { %v1399_v54 = vpop.f32.mrb[0].mxu1 }
 0x22a   :  { %v1400_v56 = vpop.f32.mrb[1].mxu1 }
 0x22b   :  { %v1401_v57 = vadd.f32 %v1400_v56, %v1399_v54  ;;  %v1402_v58 = vpop.f32.mrb[2].mxu1 }
 0x22c   :  { %v1403_v59 = vpop.f32.mrb[3].mxu1 }
 0x22d   :  { %v423_v60 = vadd.f32 %v1401_v57, %v287_v55 }
 0x22f   :  { %vm428_vm4 = vcmp.gt.f32.partialorder %v423_v60, 0.0  ;;  %v429_v61 = vmul.f32 0.01, %v423_v60 }
 0x231   :  { %v430_v62 = vsel %vm428_vm4, %v423_v60, %v429_v61 }
 0x232   :  { %v431_v63 = vrot.slane %v430_v62, 4  ;;  %v437_v1 = vmul.f32 %v430_v62, %v430_v62 }
 0x234   :  { %v432_v2 = vadd.f32 %v431_v63, %v430_v62  ;;  %v438_v3 = vrot.slane %v437_v1, 4 }
 0x236   :  { %v433_v4 = vrot.slane %v432_v2, 2  ;;  %v439_v5 = vadd.f32 %v438_v3, %v437_v1  ;;  %v474_v3 = vld [vmem:[#allocation7 + $0x12] ss:$0 sm:$0xff] }
 0x238   :  { %v434_v6 = vadd.f32 %v433_v4, %v432_v2  ;;  %v440_v7 = vrot.slane %v439_v5, 2 }
 0x23a   :  { %v435_v8 = vrot.slane %v434_v6, 1  ;;  %v441_v9 = vadd.f32 %v440_v7, %v439_v5 }
 0x23c   :  { %v442_v10 = vrot.slane %v441_v9, 1  ;;  %v436_v11 = vadd.f32 %v435_v8, %v434_v6  ;;  %v475_v6 = vld [vmem:[#allocation7 + $0x16] ss:$0 sm:$0xff] }
 0x23e   :  { %v443_v12 = vadd.f32 %v442_v10, %v441_v9  ;;  %v444_v13 = vmul.f32 0.125, %v436_v11 }
 0x240   :  { %v445_v14 = vmul.f32 0.125, %v443_v12  ;;  %v446_v15 = vmul.f32 %v444_v13, %v444_v13  ;;  %v1593_v12 = vld [vmem:[#allocation5 + $0x400] ss:$8 sps:$4 sm:$0xff]  }
 0x242   :  { %v447_v16 = vsub.f32 %v445_v14, %v446_v15  ;;  %v1595_v14 = vld [vmem:[#allocation5 + $0x420] ss:$8 sps:$4 sm:$0xff]   ;;  %v1596_v15 = vld [vmem:[#allocation5 + $0x430] ss:$8 sps:$4 sm:$0xff]  }
 0x244   :  { %v448_v17 = vmax.f32 %v447_v16, 0.0  ;;  %v1597_v16 = vld [vmem:[#allocation5 + $0x440] ss:$8 sps:$4 sm:$0xff]  }
 0x246   :  { %v449_v18 = vadd.f32 1e-05, %v448_v17  ;;  %v1598_v17 = vld [vmem:[#allocation5 + $0x450] ss:$8 sps:$4 sm:$0xff]  }
 0x248   :  { %1653 = vrsqrt.f32 %v449_v18  ;;  %v1599_v18 = vld [vmem:[#allocation5 + $0x460] ss:$8 sps:$4 sm:$0xff]  }
 0x252   :  { %v1654_v20 = vpop.eup %1653 }
 0x253   :  { %v451_v21 = vmul.f32 %v1654_v20, %v288_v19  ;;  %v1600_v19 = vld [vmem:[#allocation5 + $0x470] ss:$8 sps:$4 sm:$0xff]   ;;  %v1601_v20 = vld [vmem:[#allocation5 + $0x500] ss:$8 sps:$4 sm:$0xff]  }
 0x255   :  { %v452_v23 = vmul.f32 %v451_v21, %v444_v13  ;;  %v454_v28 = vmul.f32 %v451_v21, %v430_v62  ;;  %v1594_v13 = vld [vmem:[#allocation5 + $0x410] ss:$8 sps:$4 sm:$0xff]  }
 0x256   :  { %v1602_v21 = vld [vmem:[#allocation5 + $0x510] ss:$8 sps:$4 sm:$0xff]  }
 0x257   :  { %v453_v26 = vsub.f32 %v289_v22, %v452_v23  ;;  %v1603_v22 = vld [vmem:[#allocation5 + $0x520] ss:$8 sps:$4 sm:$0xff]   ;;  %v1604_v23 = vld [vmem:[#allocation5 + $0x530] ss:$8 sps:$4 sm:$0xff]  }
 0x259   :  { %v455_v29 = vadd.f32 %v454_v28, %v453_v26  ;;  %v1605_v26 = vld [vmem:[#allocation5 + $0x540] ss:$8 sps:$4 sm:$0xff]   ;;  %v1606_v28 = vld [vmem:[#allocation5 + $0x550] ss:$8 sps:$4 sm:$0xff]  }
 0x25b   :  { %v476_v30 = vpack.c.bf16 %v455_v29, %v455_v29  ;;  %v610_v29 = vld [vmem:[#allocation7 + $0x3] ss:$0 sm:$0xff] }
 0x25d   :  { %1480 = vmatmul.mubr.bf16.vlgmr.msra.gmra.mrb[4].mxu0 %v476_v30 }
 0x25e   :  { %1519 = vmatprep.mubr.msk.bf16.mxu0 %vm1763_vm3, %v1762_v48  ;;  %1504 = vmatpush3.bf16.msra.mxu0 %v1593_v12  ;;  %v1626_v12 = vld [vmem:[#allocation5 + $0x654] ss:$8 sps:$4 sm:$0xff]  }
 0x25f   :  { %1505 = vmatprep.subr.bf16.mxu0 %v1762_v48 }
 0x262   :  { %1506 = vmatpush3.bf16.msra.mxu0 %v1594_v13  ;;  %v1624_v13 = vld [vmem:[#allocation5 + $0x650] ss:$8 sps:$4 sm:$0xff]  }
 0x263   :  { %1507 = vmatprep.subr.bf16.mxu0 %v1762_v48 }
 0x266   :  { %1508 = vmatpush3.bf16.msra.mxu0 %v1595_v14  ;;  %v747_v14 = vld [vmem:[#allocation7 + $0x4] ss:$0 sm:$0xff] }
 0x267   :  { %1509 = vmatprep.subr.bf16.mxu0 %v1762_v48 }
 0x26a   :  { %1510 = vmatpush3.bf16.msra.mxu0 %v1596_v15 }
 0x26b   :  { %1511 = vmatprep.subr.bf16.mxu0 %v1762_v48 }
 0x26e   :  { %1512 = vmatpush3.bf16.msra.mxu0 %v1597_v16 }
 0x26f   :  { %1513 = vmatprep.subr.bf16.mxu0 %v1762_v48 }
 0x272   :  { %1514 = vmatpush3.bf16.msra.mxu0 %v1598_v17 }
 0x273   :  { %1515 = vmatprep.subr.bf16.mxu0 %v1762_v48 }
 0x276   :  { %1516 = vmatpush3.bf16.msra.mxu0 %v1599_v18 }
 0x277   :  { %1517 = vmatprep.subr.bf16.mxu0 %v1762_v48 }
 0x27a   :  { %1518 = vmatpush3.bf16.msra.mxu0 %v1600_v19 }
 0x330   :  { %v559_v24 = vpop.f32.mrb[4].mxu0 }
 0x331   :  { %v560_v42 = vadd.f32 %v559_v24, %v473_v40  ;;  %v1481_v43 = vpop.f32.mrb[5].mxu0 }
 0x332   :  { %v562_v44 = vpop.f32.mrb[6].mxu0 }
 0x333   :  { %vm565_vm5 = vcmp.gt.f32.partialorder %v560_v42, 0.0  ;;  %v566_v45 = vmul.f32 0.01, %v560_v42  ;;  %v1482_v46 = vpop.f32.mrb[7].mxu0 }
 0x335   :  { %v567_v47 = vsel %vm565_vm5, %v560_v42, %v566_v45 }
 0x336   :  { %v568_v38 = vrot.slane %v567_v47, 4  ;;  %v574_v41 = vmul.f32 %v567_v47, %v567_v47 }
 0x338   :  { %v569_v49 = vadd.f32 %v568_v38, %v567_v47  ;;  %v575_v50 = vrot.slane %v574_v41, 4 }
 0x33a   :  { %v570_v51 = vrot.slane %v569_v49, 2  ;;  %v576_v52 = vadd.f32 %v575_v50, %v574_v41 }
 0x33c   :  { %v571_v53 = vadd.f32 %v570_v51, %v569_v49  ;;  %v577_v54 = vrot.slane %v576_v52, 2 }
 0x33e   :  { %v572_v55 = vrot.slane %v571_v53, 1  ;;  %v578_v56 = vadd.f32 %v577_v54, %v576_v52 }
 0x340   :  { %v573_v57 = vadd.f32 %v572_v55, %v571_v53  ;;  %v579_v58 = vrot.slane %v578_v56, 1 }
 0x342   :  { %v580_v59 = vadd.f32 %v579_v58, %v578_v56  ;;  %v581_v60 = vmul.f32 0.125, %v573_v57  ;;  %v611_v56 = vld [vmem:[#allocation7 + $0x13] ss:$0 sm:$0xff] }
 0x344   :  { %v582_v61 = vmul.f32 0.125, %v580_v59  ;;  %v583_v62 = vmul.f32 %v581_v60, %v581_v60  ;;  %v612_v59 = vld [vmem:[#allocation7 + $0x17] ss:$0 sm:$0xff] }
 0x346   :  { %v584_v63 = vsub.f32 %v582_v61, %v583_v62 }
 0x348   :  { %v585_v1 = vmax.f32 %v584_v63, 0.0 }
 0x34a   :  { %v586_v2 = vadd.f32 1e-05, %v585_v1 }
 0x34c   :  { %1655 = vrsqrt.f32 %v586_v2  ;;  %v1607_v2 = vld [vmem:[#allocation5 + $0x560] ss:$8 sps:$4 sm:$0xff]  }
 0x356   :  { %v1656_v4 = vpop.eup %1655 }
 0x357   :  { %v588_v5 = vmul.f32 %v1656_v4, %v474_v3  ;;  %v1608_v3 = vld [vmem:[#allocation5 + $0x570] ss:$8 sps:$4 sm:$0xff]   ;;  %v1609_v4 = vld [vmem:[#allocation5 + $0x600] ss:$8 sps:$4 sm:$0xff]  }
 0x359   :  { %v589_v7 = vmul.f32 %v588_v5, %v581_v60  ;;  %v591_v8 = vmul.f32 %v588_v5, %v567_v47  ;;  %v1611_v5 = vld [vmem:[#allocation5 + $0x604] ss:$8 sps:$4 sm:$0xff]  }
 0x35a   :  { %1061 = vmatprep.subr.bf16.mxu0 %v1611_v5 }
 0x35b   :  { %v590_v9 = vsub.f32 %v475_v6, %v589_v7  ;;  %v1614_v6 = vld [vmem:[#allocation5 + $0x614] ss:$8 sps:$4 sm:$0xff]   ;;  %v1612_v7 = vld [vmem:[#allocation5 + $0x610] ss:$8 sps:$4 sm:$0xff]  }
 0x35d   :  { %v592_v10 = vadd.f32 %v591_v8, %v590_v9  ;;  %v1617_v8 = vld [vmem:[#allocation5 + $0x624] ss:$8 sps:$4 sm:$0xff]   ;;  %v1615_v9 = vld [vmem:[#allocation5 + $0x620] ss:$8 sps:$4 sm:$0xff]  }
 0x35f   :  { %v613_v11 = vpack.c.bf16 %v592_v10, %v592_v10  ;;  %v1620_v10 = vld [vmem:[#allocation5 + $0x634] ss:$8 sps:$4 sm:$0xff]  }
 0x361   :  { %1500 = vmatmul.mubr.bf16.vlgmr.msra.gmra.mrb[4].mxu1 %v613_v11  ;;  %v1623_v11 = vld [vmem:[#allocation5 + $0x644] ss:$8 sps:$4 sm:$0xff]  }
 0x362   :  { %1539 = vmatprep.mubr.msk.bf16.mxu1 %vm1763_vm3, %v1762_v48  ;;  %1524 = vmatpush3.bf16.msra.mxu1 %v1601_v20 }
 0x363   :  { %1525 = vmatprep.subr.bf16.mxu1 %v1762_v48 }
 0x366   :  { %1526 = vmatpush3.bf16.msra.mxu1 %v1602_v21 }
 0x367   :  { %1527 = vmatprep.subr.bf16.mxu1 %v1762_v48 }
 0x36a   :  { %1528 = vmatpush3.bf16.msra.mxu1 %v1603_v22 }
 0x36b   :  { %1529 = vmatprep.subr.bf16.mxu1 %v1762_v48 }
 0x36e   :  { %1530 = vmatpush3.bf16.msra.mxu1 %v1604_v23  ;;  %v1629_v23 = vld [vmem:[#allocation5 + $0x664] ss:$8 sps:$4 sm:$0xff]  }
 0x36f   :  { %1531 = vmatprep.subr.bf16.mxu1 %v1762_v48 }
 0x372   :  { %1532 = vmatpush3.bf16.msra.mxu1 %v1605_v26  ;;  %v1627_v26 = vld [vmem:[#allocation5 + $0x660] ss:$8 sps:$4 sm:$0xff]  }
 0x373   :  { %1533 = vmatprep.subr.bf16.mxu1 %v1762_v48 }
 0x376   :  { %1534 = vmatpush3.bf16.msra.mxu1 %v1606_v28  ;;  %v1632_v28 = vld [vmem:[#allocation5 + $0x674] ss:$8 sps:$4 sm:$0xff]  }
 0x377   :  { %1535 = vmatprep.subr.bf16.mxu1 %v1762_v48 }
 0x37a   :  { %1536 = vmatpush3.bf16.msra.mxu1 %v1607_v2 }
 0x37b   :  { %1537 = vmatprep.subr.bf16.mxu1 %v1762_v48  ;;  %v1621_v48 = vld [vmem:[#allocation5 + $0x640] ss:$8 sps:$4 sm:$0xff]  }
 0x37e   :  { %1538 = vmatpush3.bf16.msra.mxu1 %v1608_v3 }
 0x434   :  { %v696_v30 = vpop.f32.mrb[4].mxu1 }
 0x435   :  { %v697_v31 = vadd.f32 %v696_v30, %v610_v29  ;;  %v1501_v32 = vpop.f32.mrb[5].mxu1  ;;  %v1630_v29 = vld [vmem:[#allocation5 + $0x670] ss:$8 sps:$4 sm:$0xff]   ;;  %v1633_v30 = vld [vmem:[#allocation5 + $0x780] ss:$8 sps:$4 sm:$0xff]  }
 0x436   :  { %v699_v33 = vpop.f32.mrb[6].mxu1  ;;  %v1635_v32 = vld [vmem:[#allocation5 + $0x790] ss:$8 sps:$4 sm:$0xff]   ;;  %1441 = vmatprep.subr.bf16.mxu1 %v1633_v30 }
 0x437   :  { %vm702_vm6 = vcmp.gt.f32.partialorder %v697_v31, 0.0  ;;  %v703_v34 = vmul.f32 0.01, %v697_v31  ;;  %v1502_v35 = vpop.f32.mrb[7].mxu1  ;;  %v1636_v33 = vld [vmem:[#allocation5 + $0x710] ss:$8 sps:$4 sm:$0xff]  }
 0x438   :  { %v1638_v35 = vld [vmem:[#allocation5 + $0x720] ss:$8 sps:$4 sm:$0xff]  }
 0x439   :  { %v704_v36 = vsel %vm702_vm6, %v697_v31, %v703_v34  ;;  %v1634_v31 = vld [vmem:[#allocation5 + $0x700] ss:$8 sps:$4 sm:$0xff]  }
 0x43a   :  { %v705_v37 = vrot.slane %v704_v36, 4  ;;  %v711_v39 = vmul.f32 %v704_v36, %v704_v36  ;;  %v1637_v34 = vld [vmem:[#allocation5 + $0x7a0] ss:$8 sps:$4 sm:$0xff]  }
 0x43c   :  { %v706_v40 = vadd.f32 %v705_v37, %v704_v36  ;;  %v712_v24 = vrot.slane %v711_v39, 4  ;;  %v1640_v37 = vld [vmem:[#allocation5 + $0x730] ss:$8 sps:$4 sm:$0xff]  }
 0x43e   :  { %v707_v42 = vrot.slane %v706_v40, 2  ;;  %v713_v43 = vadd.f32 %v712_v24, %v711_v39  ;;  %v1641_v39 = vld [vmem:[#allocation5 + $0x7c0] ss:$8 sps:$4 sm:$0xff]   ;;  %v1643_v24 = vld [vmem:[#allocation5 + $0x7d0] ss:$8 sps:$4 sm:$0xff]  }
 0x440   :  { %v708_v44 = vadd.f32 %v707_v42, %v706_v40  ;;  %v714_v45 = vrot.slane %v713_v43, 2  ;;  %v1642_v40 = vld [vmem:[#allocation5 + $0x740] ss:$8 sps:$4 sm:$0xff]   ;;  %v1644_v42 = vld [vmem:[#allocation5 + $0x750] ss:$8 sps:$4 sm:$0xff]  }
 0x442   :  { %v709_v46 = vrot.slane %v708_v44, 1  ;;  %v715_v47 = vadd.f32 %v714_v45, %v713_v43  ;;  %v857_v43 = vld [vmem:[#allocation7 + $0x5] ss:$0 sm:$0xff] }
 0x444   :  { %v710_v38 = vadd.f32 %v709_v46, %v708_v44  ;;  %v716_v41 = vrot.slane %v715_v47, 1 }
 0x446   :  { %v717_v49 = vadd.f32 %v716_v41, %v715_v47  ;;  %v718_v50 = vmul.f32 0.125, %v710_v38 }
 0x448   :  { %v719_v51 = vmul.f32 0.125, %v717_v49  ;;  %v720_v52 = vmul.f32 %v718_v50, %v718_v50 }
 0x44a   :  { %v721_v53 = vsub.f32 %v719_v51, %v720_v52  ;;  %v1645_v51 = vld [vmem:[#allocation5 + $0x7e0] ss:$8 sps:$4 sm:$0xff]  }
 0x44b   :  { %v1646_v52 = vld [vmem:[#allocation5 + $0x760] ss:$8 sps:$4 sm:$0xff]  }
 0x44c   :  { %v722_v54 = vmax.f32 %v721_v53, 0.0  ;;  %v1647_v53 = vld [vmem:[#allocation5 + $0x7f0] ss:$8 sps:$4 sm:$0xff]  }
 0x44e   :  { %v723_v55 = vadd.f32 1e-05, %v722_v54  ;;  %v1648_v54 = vld [vmem:[#allocation5 + $0x770] ss:$8 sps:$4 sm:$0xff]  }
 0x450   :  { %1657 = vrsqrt.f32 %v723_v55  ;;  %v968_v55 = vld [vmem:[#allocation7 + $0x6] ss:$8 sm:$0x3] }
 0x45a   :  { %v1658_v57 = vpop.eup %1657 }
 0x45b   :  { %v725_v58 = vmul.f32 %v1658_v57, %v611_v56  ;;  %v974_v56 = vrot.slane %v968_v55, %v1823_v25  ;;  %v978_v57 = vrot.slane %v968_v55, %v1825_v27  ;;  %v1141_v25 = vld [vmem:[#allocation7 + $0x7] ss:$0 sm:$0xff] }
 0x45d   :  { %v726_v60 = vmul.f32 %v725_v58, %v718_v50  ;;  %v728_v61 = vmul.f32 %v725_v58, %v704_v36  ;;  %v1639_v36 = vld [vmem:[#allocation5 + $0x7b0] ss:$8 sps:$4 sm:$0xff]  }
 0x45f   :  { %v727_v62 = vsub.f32 %v612_v59, %v726_v60 }
 0x461   :  { %v729_v63 = vadd.f32 %v728_v61, %v727_v62 }
 0x463   :  { %v748_v1 = vpack.c.bf16 %v729_v63, %v729_v63 }
 0x465   :  { %1520 = vmatmul.mubr.bf16.vlgmr.msra.gmra.mrb[8].mxu0 %v748_v1 }
 0x466   :  { %1093 = vmatprep.mubr.bf16.mxu0 %v1760_v0  ;;  %1062 = vmatpush1.bf16.msra.mxu0 %v1609_v4  ;;  %v1618_v0 = vld [vmem:[#allocation5 + $0x630] ss:$8 sps:$4 sm:$0xff]  }
 0x467   :  { %1063 = vmatprep.subr.bf16.mxu0 %v1614_v6 }
 0x46a   :  { %1064 = vmatpush1.bf16.msra.mxu0 %v1612_v7 }
 0x46b   :  { %1065 = vmatprep.subr.bf16.mxu0 %v1617_v8 }
 0x46e   :  { %1066 = vmatpush1.bf16.msra.mxu0 %v1615_v9 }
 0x46f   :  { %1067 = vmatprep.subr.bf16.mxu0 %v1620_v10 }
 0x472   :  { %1068 = vmatpush1.bf16.msra.mxu0 %v1618_v0 }
 0x473   :  { %1069 = vmatprep.subr.bf16.mxu0 %v1623_v11 }
 0x476   :  { %1070 = vmatpush1.bf16.msra.mxu0 %v1621_v48 }
 0x477   :  { %1071 = vmatprep.subr.bf16.mxu0 %v1626_v12 }
 0x47a   :  { %1072 = vmatpush1.bf16.msra.mxu0 %v1624_v13 }
 0x47b   :  { %1073 = vmatprep.subr.bf16.mxu0 %v1629_v23 }
 0x47e   :  { %1074 = vmatpush1.bf16.msra.mxu0 %v1627_v26 }
 0x47f   :  { %1075 = vmatprep.subr.bf16.mxu0 %v1632_v28 }
 0x482   :  { %1076 = vmatpush1.bf16.msra.mxu0 %v1630_v29 }
 0x538   :  { %v831_v15 = vpop.f32.mrb[8].mxu0 }
 0x539   :  { %v832_v16 = vadd.f32 %v831_v15, %v747_v14  ;;  %v1521_v17 = vpop.f32.mrb[9].mxu0 }
 0x53a   :  { %v834_v18 = vpop.f32.mrb[10].mxu0 }
 0x53b   :  { %vm837_vm7 = vcmp.gt.f32.partialorder %v832_v16, 0.0  ;;  %v838_v19 = vmul.f32 0.01, %v832_v16  ;;  %v1522_v20 = vpop.f32.mrb[11].mxu0 }
 0x53d   :  { %v839_v21 = vsel %vm837_vm7, %v832_v16, %v838_v19 }
 0x53e   :  { %v858_v22 = vpack.c.bf16 %v839_v21, %v839_v21 }
 0x540   :  { %1540 = vmatmul.mubr.bf16.vlgmr.msra.gmra.mrb[8].mxu1 %v858_v22 }
 0x541   :  { %1442 = vmatpush3.bf16.msra.mxu1 %v1634_v31 }
 0x542   :  { %1443 = vmatprep.subr.bf16.mxu1 %v1635_v32 }
 0x545   :  { %1444 = vmatpush3.bf16.msra.mxu1 %v1636_v33 }
 0x546   :  { %1445 = vmatprep.subr.bf16.mxu1 %v1637_v34 }
 0x549   :  { %1446 = vmatpush3.bf16.msra.mxu1 %v1638_v35 }
 0x54a   :  { %1447 = vmatprep.subr.bf16.mxu1 %v1639_v36 }
 0x54d   :  { %1448 = vmatpush3.bf16.msra.mxu1 %v1640_v37 }
 0x54e   :  { %1449 = vmatprep.subr.bf16.mxu1 %v1641_v39 }
 0x551   :  { %1450 = vmatpush3.bf16.msra.mxu1 %v1642_v40 }
 0x552   :  { %1451 = vmatprep.subr.bf16.mxu1 %v1643_v24 }
 0x555   :  { %1452 = vmatpush3.bf16.msra.mxu1 %v1644_v42 }
 0x556   :  { %1453 = vmatprep.subr.bf16.mxu1 %v1645_v51 }
 0x559   :  { %1454 = vmatpush3.bf16.msra.mxu1 %v1646_v52 }
 0x55a   :  { %1455 = vmatprep.subr.bf16.mxu1 %v1647_v53 }
 0x55d   :  { %1456 = vmatpush3.bf16.msra.mxu1 %v1648_v54 }
 0x613   :  { %v941_v44 = vpop.f32.mrb[8].mxu1 }
 0x614   :  { %v942_v45 = vadd.f32 %v941_v44, %v857_v43  ;;  %v1541_v46 = vpop.f32.mrb[9].mxu1 }
 0x615   :  { %v944_v47 = vpop.f32.mrb[10].mxu1 }
 0x616   :  { %vm947_vm8 = vcmp.gt.f32.partialorder %v942_v45, 0.0  ;;  %v948_v38 = vmul.f32 0.01, %v942_v45  ;;  %v1542_v41 = vpop.f32.mrb[11].mxu1 }
 0x618   :  { %v949_v49 = vsel %vm947_vm8, %v942_v45, %v948_v38 }
 0x619   :  { %v969_v50 = vpack.c.bf16 %v949_v49, %v949_v49 }
 0x61b   :  { %1094 = vmatmul.mubr.bf16.vlgmr.msra.gmra.mrb[12].mxu0 %v969_v50 }
 0x6ee   :  { %v1095_v58 = vpop.f32.mrb[12].mxu0 }
 0x6ef   :  { %v1096_v59 = vadd.f32 %v1095_v58, %v974_v56  ;;  %v1097_v60 = vpop.f32.mrb[13].mxu0 }
 0x6f0   :  { %v1098_v61 = vadd.f32 %v1097_v60, %v978_v57  ;;  %v1099_v62 = vpop.f32.mrb[14].mxu0 }
 0x6f1   :  { %vm1102_vm9 = vcmp.gt.f32.partialorder %v1096_v59, 0.0  ;;  %v1104_v63 = vmul.f32 0.01, %v1096_v59  ;;  %v1100_v1 = vpop.f32.mrb[15].mxu0 }
 0x6f2   :  { %vm1103_vm10 = vcmp.gt.f32.partialorder %v1098_v61, 0.0  ;;  %v1105_v2 = vmul.f32 0.01, %v1098_v61 }
 0x6f3   :  { %v1106_v3 = vsel %vm1102_vm9, %v1096_v59, %v1104_v63 }
 0x6f4   :  { %v1107_v4 = vsel %vm1103_vm10, %v1098_v61, %v1105_v2  ;;  %v1142_v6 = vpack.c.bf16 %v1106_v3, %v1106_v3 }
 0x6f5   :  { %v1143_v5 = vpack.c.bf16 %v1107_v4, %v1107_v4 }
 0x6f7   :  { %1272 = vmatprep.mubr.bf16.mxu1 %v1143_v5 }
 0x6f8   :  { %1273 = vmatmul.mubr.bf16.vlgmr.msra.gmra.mrb[12].mxu1 %v1142_v6 }
 0x7cb   :  { %v1457_v7 = vpop.f32.mrb[12].mxu1 }
 0x7cc   :  { %v1458_v8 = vpop.f32.mrb[13].mxu1 }
 0x7cd   :  { %v1459_v27 = vadd.f32 %v1458_v8, %v1457_v7  ;;  %v1460_v9 = vpop.f32.mrb[14].mxu1 }
 0x7ce   :  { %v1461_v10 = vpop.f32.mrb[15].mxu1 }
 0x7cf   :  { %v1275_v0 = vadd.f32 %v1459_v27, %v1141_v25 }
 0x7d1   :  { %v1280_v11 = vmax.f32 %v1275_v0, 0.0 }
 0x7d3   :  { %1281 = vst.msk [vmem:[#allocation8] sm:$0xff] %vm97_vm0, %v1280_v11 }
 0x7d4   :  { %1736 = shalt.err (!%p1733_p0)
}
 0x7d5   :  { %s1737_s27 = scalar_lea.hbm %s1892_s3, 128 }
 0x7d6   :  { %p1738_p1 = scmp.ne.s32.totalorder %s1892_s3, %s1737_s27  ;;  %p1741_p2 = scmp.lt.u32.totalorder %s1737_s27, %s1892_s3 }
 0x7d8   :  { %p1743_p3 = pnand %p1741_p2, %p1738_p1 }
 0x7da   :  { %1746 = shalt.err (!%p1743_p3)
}
 0x7db   :  { %1291 = dma.vmem_to_hbm [thread:$0]  %s1289_s23, 128, %s1892_s3, [#allocation4]  }
 0x7dc   :  { %1751 = dma.done.wait [#allocation4], 128  }
 0x7dd   :  { %1752 = vsyncadd [#allocation4], 4294967168 }
 0x7de   :  { %1295 = vsyncpa [#allocation3], 1 }
 0x7df   :  { %1296 = vsyncpa [#allocation6], 1 }
 0x7e0   :  { %1297 = vsyncpa [#allocation4], 1 }

</bundles_post_ra>
